<compile_context>
chip_gen: v7x
topology: tpu7x:2x2x1
jax: 0.10.0
libtpu: 0.0.40
codegen_flags: <defaults>
</compile_context>

<pallas_src>
import jax
import jax.numpy as jnp
from jax.experimental import pallas as pl
from jax.experimental.pallas import tpu as pltpu


# ------------------------------ fused kernel ------------------------------- #

def _fused_kernel(x_ref, w1_ref, b1_ref, w2_ref, b2_ref,
                  wf1_ref, bf1_ref, wf2_ref, bf2_ref, o_ref):
    # x_ref  : (6*tn, 120) bf16   rows = window-major then sample, feature = kw*8 + kh
    # w1_ref : (120, 150)  bf16   block-diag conv1 weight, (2/3) folded in
    # b1_ref : (1, 150)    f32
    # w2_ref : (150, 50)   bf16   conv2 weight (rows kw*10+ic), 0.5*1.7159 folded in
    # b2_ref : (1, 50)     f32
    # wf1_ref: (6, 50, 100) bf16  fc1 per-window slabs, 0.25 folded in
    # bf1_ref: (1, 100)    f32    0.5*bf1 + 0.25*rowsum(Wf1) folded in
    # wf2_ref: (100, 2)    bf16   0.25*Wf2^T
    # bf2_ref: (1, 2)      f32    0.5*bf2 + 0.25*rowsum(Wf2)
    # o_ref  : (tn, 2)     f32
    tn = o_ref.shape[0]
    bf16 = jnp.bfloat16

    xb = x_ref[...]                                                    # (6*tn, 120)
    # conv1 over all 6 windows in one long-M matmul (block-diagonal weight)
    z1 = jnp.dot(xb, w1_ref[...], preferred_element_type=jnp.float32) + b1_ref[...]
    t1 = jnp.tanh(z1).astype(bf16)                                     # (6*tn, 150)
    # conv2 for all 6 windows in one matmul (sigmoid pre-scale folded into weight)
    z2 = jnp.dot(t1, w2_ref[...], preferred_element_type=jnp.float32) + b2_ref[...]
    t2 = jnp.tanh(z2).astype(bf16)                                     # (6*tn, 50)

    # fc1: accumulate the 6 per-window partial contributions (static unroll,
    # sublane-aligned static slices since tn % 16 == 0)
    acc = jnp.dot(t2[0:tn, :], wf1_ref[0], preferred_element_type=jnp.float32)
    for w in range(1, 6):
        acc = acc + jnp.dot(t2[w * tn:(w + 1) * tn, :], wf1_ref[w],
                            preferred_element_type=jnp.float32)
    t3 = jnp.tanh(acc + bf1_ref[...]).astype(bf16)                     # (tn, 100)

    # fc2 + final sigmoid (only affine work left: 0.5*tanh+0.5 on (tn, 2))
    z4 = jnp.dot(t3, wf2_ref[...], preferred_element_type=jnp.float32) + bf2_ref[...]
    o_ref[...] = 0.5 * jnp.tanh(z4) + 0.5


# --------------------------- static weight prep ----------------------------- #

def _prepare_weights(params):
    """Fold all layout permutations AND activation affine constants into static
    weights (zero runtime cost); store MXU operands in bf16."""
    w1c, b1c, w2c, b2c, wf1, bf1, wf2, bf2 = params
    f32, bf16 = jnp.float32, jnp.bfloat16

    # conv1: fold the 2/3 tanh pre-scale; expand to block-diag over the 15
    # positions of one conv2 window -> (120, 150), col = kw*10 + oc
    w1m = (2.0 / 3.0) * w1c.reshape(10, 8).T                           # (8, 10) [kh, oc]
    w1big = (jnp.eye(15, dtype=f32)[:, None, :, None]
             * w1m[None, :, None, :]).reshape(120, 150)
    b1big = jnp.tile((2.0 / 3.0) * b1c, 15).reshape(1, 150)

    # conv2: fold 1.7159 (conv1 activation gain) and the 0.5 sigmoid pre-scale;
    # rows ordered kw*10 + ic to match conv1's output columns
    w2m = (0.5 * 1.7159) * jnp.transpose(
        w2c.reshape(50, 10, 15), (2, 1, 0)).reshape(150, 50)
    b2m = (0.5 * b2c).reshape(1, 50)

    # fc1: input is sigmoid(z2) = 0.5*t2 + 0.5; also fold the next 0.5 pre-scale.
    # z3'' = t2 @ (0.25*Wf1_w^T) + 0.5*bf1 + 0.25*rowsum(Wf1)
    wf1s = 0.25 * jnp.transpose(wf1.reshape(100, 50, 6), (2, 1, 0))    # (6, 50, 100)
    bf1m = (0.5 * bf1 + 0.25 * jnp.sum(wf1, axis=1)).reshape(1, 100)

    # fc2: input is sigmoid(z3) = 0.5*t3 + 0.5; also fold the FINAL 0.5 pre-scale.
    wf2m = 0.25 * wf2.T                                                # (100, 2)
    bf2m = (0.5 * bf2 + 0.25 * jnp.sum(wf2, axis=1)).reshape(1, 2)

    return (w1big.astype(bf16), b1big.astype(f32),
            w2m.astype(bf16), b2m.astype(f32),
            wf1s.astype(bf16), bf1m.astype(f32),
            wf2m.astype(bf16), bf2m.astype(f32))


# ------------------------------ forward pass ------------------------------- #

_SUBLANE = 16  # bf16 sublane packing


def _round_up(v, m):
    return ((v + m - 1) // m) * m


def net_nonsquare_forward(x, params, *, block_n=1024):
    """x: (N, 1, 8, 90) NCHW float32 -> (N, 2)."""
    N, C, H, W = x.shape
    assert (C, H, W) == (1, 8, 90), "kernel assumes the (1, 8, 90) input the module implies"
    weights = _prepare_weights(params)

    # Batch tile: multiple of 16 (bf16 sublanes / sublane-dense output stores),
    # capped at block_n, and <= ~N/2 for medium batches so the grid has >= 2
    # steps and both v7x TensorCores get work.
    tn = min(_round_up(block_n, _SUBLANE),
             max(_SUBLANE, _round_up(-(-N // 2), _SUBLANE)))
    n_tot = _round_up(N, tn)
    n_tiles = n_tot // tn

    xp = x if n_tot == N else jnp.pad(x, ((0, n_tot - N), (0, 0), (0, 0), (0, 0)))
    # (n_tot,1,8,90) -> rows ordered (tile, window, sample), feature = kw*8 + kh,
    # so one grid step reads a contiguous (6*tn, 120) slab (no in-kernel reshape).
    xw = xp[:, 0].reshape(n_tiles, tn, 8, 6, 15)           # [tile, s, kh, win, kw]
    xw = jnp.transpose(xw, (0, 3, 1, 4, 2))                # [tile, win, s, kw, kh]
    xw = xw.reshape(n_tiles * 6 * tn, 120).astype(jnp.bfloat16)

    full2 = lambda i: (0, 0)
    full3 = lambda i: (0, 0, 0)

    out = pl.pallas_call(
        _fused_kernel,
        out_shape=jax.ShapeDtypeStruct((n_tot, 2), jnp.float32),
        grid=(n_tiles,),
        in_specs=[
            pl.BlockSpec((6 * tn, 120), lambda i: (i, 0)),   # activations (batch-tiled)
            pl.BlockSpec((120, 150), full2),                 # conv1 block-diag weight
            pl.BlockSpec((1, 150), full2),
            pl.BlockSpec((150, 50), full2),                  # conv2 weight
            pl.BlockSpec((1, 50), full2),
            pl.BlockSpec((6, 50, 100), full3),               # fc1 weight per window
            pl.BlockSpec((1, 100), full2),
            pl.BlockSpec((100, 2), full2),                   # fc2 weight
            pl.BlockSpec((1, 2), full2),
        ],
        out_specs=pl.BlockSpec((tn, 2), lambda i: (i, 0)),
        compiler_params=pltpu.CompilerParams(
            dimension_semantics=("parallel",),               # batch axis -> 2 TCs on v7x
            vmem_limit_bytes=48 * 1024 * 1024,               # under the v7x 64 MiB cap
        ),
        cost_estimate=pl.CostEstimate(
            flops=2 * n_tot * (6 * (120 * 150 + 150 * 50 + 50 * 100) + 100 * 2),
            transcendentals=n_tot * (6 * (150 + 50) + 100 + 2),
            bytes_accessed=(2 * n_tot * 6 * 120 + 4 * n_tot * 2
                            + 2 * (120 * 150 + 150 * 50 + 6 * 50 * 100 + 100 * 2)
                            + 4 * (150 + 50 + 100 + 2)),
        ),
    )(xw, *weights)
    return out[:N]


# ------------------------- reference (pure JAX/XLA) ------------------------- #

def reference_forward(x, params):
    w1c, b1c, w2c, b2c, wf1, bf1, wf2, bf2 = params
    dn = ("NCHW", "OIHW", "NCHW")
    y = jax.lax.conv_general_dilated(x, w1c, (1, 1), "VALID", dimension_numbers=dn)
    y = y + b1c.reshape(1, 10, 1, 1)
    y = 1.7159 * jnp.tanh((2.0 / 3.0) * y)
    y = jax.lax.conv_general_dilated(y, w2c, (15, 15), "VALID", dimension_numbers=dn)
    y = y + b2c.reshape(1, 50, 1, 1)
    y = y.reshape(x.shape[0], 50 * 6)
    y = jax.nn.sigmoid(y) @ wf1.T + bf1
    y = jax.nn.sigmoid(y) @ wf2.T + bf2
    return jax.nn.sigmoid(y)


# ---------------------------------- main ----------------------------------- #

def _init_params(key):
    ks = jax.random.split(key, 8)

    def u(k, shape, fan_in):
        bound = 1.0 / jnp.sqrt(fan_in)
        return jax.random.uniform(k, shape, jnp.float32, -bound, bound)

    w1c = u(ks[0], (10, 1, 8, 1), 8)        # conv1 weight
    b1c = u(ks[1], (10,), 8)                # conv1 bias
    w2c = u(ks[2], (50, 10, 1, 15), 150)    # conv2 weight
    b2c = u(ks[3], (50,), 150)              # conv2 bias
    wf1 = u(ks[4], (100, 300), 300)         # fc1 weight
    bf1 = u(ks[5], (100,), 300)             # fc1 bias
    wf2 = u(ks[6], (2, 100), 100)           # fc2 weight
    bf2 = u(ks[7], (2,), 100)               # fc2 bias
    return (w1c, b1c, w2c, b2c, wf1, bf1, wf2, bf2)


if __name__ == "__main__":
    key = jax.random.PRNGKey(0)
    kx, kp = jax.random.split(key)

    # Input shape implied by the module: conv1 (8,1) collapses H=8 -> 1,
    # conv2 (1,15)/stride 15 needs W=90 so 6 windows remain (50*6 = 300).
    N = 2
    x = jax.random.normal(kx, (N, 1, 8, 90), jnp.float32)
    params = _init_params(kp)

    fwd = jax.jit(net_nonsquare_forward)
    out = jax.block_until_ready(fwd(x, params))
    ref = jax.block_until_ready(reference_forward(x, params))

    assert out.shape == (N, 2), out.shape
    assert bool(jnp.all(jnp.isfinite(out)))
    assert bool(jnp.allclose(out, ref, rtol=5e-3, atol=5e-3)), (out, ref)

    print("KERNEL_OK")
</pallas_src>

<mosaic_0001>
module attributes {stable_mosaic.version = 11 : i64} {
  func.func @_fused_kernel(%arg0: i32, %arg1: memref<96x120xbf16, #tpu.memory_space<vmem>>, %arg2: memref<120x150xbf16, #tpu.memory_space<vmem>>, %arg3: memref<1x150xf32, #tpu.memory_space<vmem>>, %arg4: memref<150x50xbf16, #tpu.memory_space<vmem>>, %arg5: memref<1x50xf32, #tpu.memory_space<vmem>>, %arg6: memref<6x50x100xbf16, #tpu.memory_space<vmem>>, %arg7: memref<1x100xf32, #tpu.memory_space<vmem>>, %arg8: memref<100x2xbf16, #tpu.memory_space<vmem>>, %arg9: memref<1x2xf32, #tpu.memory_space<vmem>>, %arg10: memref<16x2xf32, #tpu.memory_space<vmem>>) attributes {dimension_semantics = [#tpu.dimension_semantics<parallel>], iteration_bounds = array<i64: 1>, scalar_prefetch = 0 : i64, scratch_operands = 0 : i64, tpu.core_type = #tpu.core_type<tc>, window_params = [{transform_indices = @transform_0, window_bounds = array<i64: 96, 120>}, {pipeline_mode = #tpu.pipeline_mode<synchronous>, transform_indices = @transform_1, window_bounds = array<i64: 120, 150>}, {pipeline_mode = #tpu.pipeline_mode<synchronous>, transform_indices = @transform_2, window_bounds = array<i64: 1, 150>}, {pipeline_mode = #tpu.pipeline_mode<synchronous>, transform_indices = @transform_3, window_bounds = array<i64: 150, 50>}, {pipeline_mode = #tpu.pipeline_mode<synchronous>, transform_indices = @transform_4, window_bounds = array<i64: 1, 50>}, {pipeline_mode = #tpu.pipeline_mode<synchronous>, transform_indices = @transform_5, window_bounds = array<i64: 6, 50, 100>}, {pipeline_mode = #tpu.pipeline_mode<synchronous>, transform_indices = @transform_6, window_bounds = array<i64: 1, 100>}, {pipeline_mode = #tpu.pipeline_mode<synchronous>, transform_indices = @transform_7, window_bounds = array<i64: 100, 2>}, {pipeline_mode = #tpu.pipeline_mode<synchronous>, transform_indices = @transform_8, window_bounds = array<i64: 1, 2>}, {transform_indices = @transform_9, window_bounds = array<i64: 16, 2>}]} {
    %c0 = arith.constant 0 : index
    %c0_0 = arith.constant 0 : index
    %0 = vector.load %arg1[%c0, %c0_0] : memref<96x120xbf16, #tpu.memory_space<vmem>>, vector<96x120xbf16>
    %c0_1 = arith.constant 0 : index
    %c0_2 = arith.constant 0 : index
    %1 = vector.load %arg2[%c0_1, %c0_2] : memref<120x150xbf16, #tpu.memory_space<vmem>>, vector<120x150xbf16>
    %cst = arith.constant dense<0.000000e+00> : vector<96x150xf32>
    %2 = tpu.matmul %0, %1, %cst {dimension_numbers = #tpu.dot_dimension_numbers<[1], [0], [0], [1], [0, 0, 1, 1], [], []>} : vector<96x120xbf16>, vector<120x150xbf16>, vector<96x150xf32> -> vector<96x150xf32>
    %c0_3 = arith.constant 0 : index
    %c0_4 = arith.constant 0 : index
    %3 = vector.load %arg3[%c0_3, %c0_4] : memref<1x150xf32, #tpu.memory_space<vmem>>, vector<1x150xf32>
    %4 = vector.broadcast %3 : vector<1x150xf32> to vector<96x150xf32>
    %5 = arith.addf %2, %4 : vector<96x150xf32>
    %6 = math.tanh %5 : vector<96x150xf32>
    %7 = arith.truncf %6 : vector<96x150xf32> to vector<96x150xbf16>
    %c0_5 = arith.constant 0 : index
    %c0_6 = arith.constant 0 : index
    %8 = vector.load %arg4[%c0_5, %c0_6] : memref<150x50xbf16, #tpu.memory_space<vmem>>, vector<150x50xbf16>
    %cst_7 = arith.constant dense<0.000000e+00> : vector<96x50xf32>
    %9 = tpu.matmul %7, %8, %cst_7 {dimension_numbers = #tpu.dot_dimension_numbers<[1], [0], [0], [1], [0, 0, 1, 1], [], []>} : vector<96x150xbf16>, vector<150x50xbf16>, vector<96x50xf32> -> vector<96x50xf32>
    %c0_8 = arith.constant 0 : index
    %c0_9 = arith.constant 0 : index
    %10 = vector.load %arg5[%c0_8, %c0_9] : memref<1x50xf32, #tpu.memory_space<vmem>>, vector<1x50xf32>
    %11 = vector.broadcast %10 : vector<1x50xf32> to vector<96x50xf32>
    %12 = arith.addf %9, %11 : vector<96x50xf32>
    %13 = math.tanh %12 : vector<96x50xf32>
    %14 = arith.truncf %13 : vector<96x50xf32> to vector<96x50xbf16>
    %15 = vector.extract_strided_slice %14 {offsets = [0, 0], sizes = [16, 50], strides = [1, 1]} : vector<96x50xbf16> to vector<16x50xbf16>
    %c0_10 = arith.constant 0 : index
    %c0_11 = arith.constant 0 : index
    %c0_12 = arith.constant 0 : index
    %16 = vector.load %arg6[%c0_10, %c0_11, %c0_12] : memref<6x50x100xbf16, #tpu.memory_space<vmem>>, vector<1x50x100xbf16>
    %17 = vector.shape_cast %16 : vector<1x50x100xbf16> to vector<50x100xbf16>
    %cst_13 = arith.constant dense<0.000000e+00> : vector<16x100xf32>
    %18 = tpu.matmul %15, %17, %cst_13 {dimension_numbers = #tpu.dot_dimension_numbers<[1], [0], [0], [1], [0, 0, 1, 1], [], []>} : vector<16x50xbf16>, vector<50x100xbf16>, vector<16x100xf32> -> vector<16x100xf32>
    %19 = vector.extract_strided_slice %14 {offsets = [16, 0], sizes = [16, 50], strides = [1, 1]} : vector<96x50xbf16> to vector<16x50xbf16>
    %c1 = arith.constant 1 : index
    %c0_14 = arith.constant 0 : index
    %c0_15 = arith.constant 0 : index
    %20 = vector.load %arg6[%c1, %c0_14, %c0_15] : memref<6x50x100xbf16, #tpu.memory_space<vmem>>, vector<1x50x100xbf16>
    %21 = vector.shape_cast %20 : vector<1x50x100xbf16> to vector<50x100xbf16>
    %cst_16 = arith.constant dense<0.000000e+00> : vector<16x100xf32>
    %22 = tpu.matmul %19, %21, %cst_16 {dimension_numbers = #tpu.dot_dimension_numbers<[1], [0], [0], [1], [0, 0, 1, 1], [], []>} : vector<16x50xbf16>, vector<50x100xbf16>, vector<16x100xf32> -> vector<16x100xf32>
    %23 = arith.addf %18, %22 : vector<16x100xf32>
    %24 = vector.extract_strided_slice %14 {offsets = [32, 0], sizes = [16, 50], strides = [1, 1]} : vector<96x50xbf16> to vector<16x50xbf16>
    %c2 = arith.constant 2 : index
    %c0_17 = arith.constant 0 : index
    %c0_18 = arith.constant 0 : index
    %25 = vector.load %arg6[%c2, %c0_17, %c0_18] : memref<6x50x100xbf16, #tpu.memory_space<vmem>>, vector<1x50x100xbf16>
    %26 = vector.shape_cast %25 : vector<1x50x100xbf16> to vector<50x100xbf16>
    %cst_19 = arith.constant dense<0.000000e+00> : vector<16x100xf32>
    %27 = tpu.matmul %24, %26, %cst_19 {dimension_numbers = #tpu.dot_dimension_numbers<[1], [0], [0], [1], [0, 0, 1, 1], [], []>} : vector<16x50xbf16>, vector<50x100xbf16>, vector<16x100xf32> -> vector<16x100xf32>
    %28 = arith.addf %23, %27 : vector<16x100xf32>
    %29 = vector.extract_strided_slice %14 {offsets = [48, 0], sizes = [16, 50], strides = [1, 1]} : vector<96x50xbf16> to vector<16x50xbf16>
    %c3 = arith.constant 3 : index
    %c0_20 = arith.constant 0 : index
    %c0_21 = arith.constant 0 : index
    %30 = vector.load %arg6[%c3, %c0_20, %c0_21] : memref<6x50x100xbf16, #tpu.memory_space<vmem>>, vector<1x50x100xbf16>
    %31 = vector.shape_cast %30 : vector<1x50x100xbf16> to vector<50x100xbf16>
    %cst_22 = arith.constant dense<0.000000e+00> : vector<16x100xf32>
    %32 = tpu.matmul %29, %31, %cst_22 {dimension_numbers = #tpu.dot_dimension_numbers<[1], [0], [0], [1], [0, 0, 1, 1], [], []>} : vector<16x50xbf16>, vector<50x100xbf16>, vector<16x100xf32> -> vector<16x100xf32>
    %33 = arith.addf %28, %32 : vector<16x100xf32>
    %34 = vector.extract_strided_slice %14 {offsets = [64, 0], sizes = [16, 50], strides = [1, 1]} : vector<96x50xbf16> to vector<16x50xbf16>
    %c4 = arith.constant 4 : index
    %c0_23 = arith.constant 0 : index
    %c0_24 = arith.constant 0 : index
    %35 = vector.load %arg6[%c4, %c0_23, %c0_24] : memref<6x50x100xbf16, #tpu.memory_space<vmem>>, vector<1x50x100xbf16>
    %36 = vector.shape_cast %35 : vector<1x50x100xbf16> to vector<50x100xbf16>
    %cst_25 = arith.constant dense<0.000000e+00> : vector<16x100xf32>
    %37 = tpu.matmul %34, %36, %cst_25 {dimension_numbers = #tpu.dot_dimension_numbers<[1], [0], [0], [1], [0, 0, 1, 1], [], []>} : vector<16x50xbf16>, vector<50x100xbf16>, vector<16x100xf32> -> vector<16x100xf32>
    %38 = arith.addf %33, %37 : vector<16x100xf32>
    %39 = vector.extract_strided_slice %14 {offsets = [80, 0], sizes = [16, 50], strides = [1, 1]} : vector<96x50xbf16> to vector<16x50xbf16>
    %c5 = arith.constant 5 : index
    %c0_26 = arith.constant 0 : index
    %c0_27 = arith.constant 0 : index
    %40 = vector.load %arg6[%c5, %c0_26, %c0_27] : memref<6x50x100xbf16, #tpu.memory_space<vmem>>, vector<1x50x100xbf16>
    %41 = vector.shape_cast %40 : vector<1x50x100xbf16> to vector<50x100xbf16>
    %cst_28 = arith.constant dense<0.000000e+00> : vector<16x100xf32>
    %42 = tpu.matmul %39, %41, %cst_28 {dimension_numbers = #tpu.dot_dimension_numbers<[1], [0], [0], [1], [0, 0, 1, 1], [], []>} : vector<16x50xbf16>, vector<50x100xbf16>, vector<16x100xf32> -> vector<16x100xf32>
    %43 = arith.addf %38, %42 : vector<16x100xf32>
    %c0_29 = arith.constant 0 : index
    %c0_30 = arith.constant 0 : index
    %44 = vector.load %arg7[%c0_29, %c0_30] : memref<1x100xf32, #tpu.memory_space<vmem>>, vector<1x100xf32>
    %45 = vector.broadcast %44 : vector<1x100xf32> to vector<16x100xf32>
    %46 = arith.addf %43, %45 : vector<16x100xf32>
    %47 = math.tanh %46 : vector<16x100xf32>
    %48 = arith.truncf %47 : vector<16x100xf32> to vector<16x100xbf16>
    %c0_31 = arith.constant 0 : index
    %c0_32 = arith.constant 0 : index
    %49 = vector.load %arg8[%c0_31, %c0_32] : memref<100x2xbf16, #tpu.memory_space<vmem>>, vector<100x2xbf16>
    %cst_33 = arith.constant dense<0.000000e+00> : vector<16x2xf32>
    %50 = tpu.matmul %48, %49, %cst_33 {dimension_numbers = #tpu.dot_dimension_numbers<[1], [0], [0], [1], [0, 0, 1, 1], [], []>} : vector<16x100xbf16>, vector<100x2xbf16>, vector<16x2xf32> -> vector<16x2xf32>
    %c0_34 = arith.constant 0 : index
    %c0_35 = arith.constant 0 : index
    %51 = vector.load %arg9[%c0_34, %c0_35] : memref<1x2xf32, #tpu.memory_space<vmem>>, vector<1x2xf32>
    %52 = vector.broadcast %51 : vector<1x2xf32> to vector<16x2xf32>
    %53 = arith.addf %50, %52 : vector<16x2xf32>
    %54 = math.tanh %53 : vector<16x2xf32>
    %cst_36 = arith.constant 5.000000e-01 : f32
    %55 = vector.broadcast %cst_36 : f32 to vector<16x2xf32>
    %56 = arith.mulf %55, %54 : vector<16x2xf32>
    %cst_37 = arith.constant 5.000000e-01 : f32
    %57 = vector.broadcast %cst_37 : f32 to vector<16x2xf32>
    %58 = arith.addf %56, %57 : vector<16x2xf32>
    %c0_38 = arith.constant 0 : index
    %c0_39 = arith.constant 0 : index
    %59 = vector.load %arg10[%c0_38, %c0_39] : memref<16x2xf32, #tpu.memory_space<vmem>>, vector<16x2xf32>
    tpu.vector_store %arg10[%c0_38, %c0_39], %58 {strides = array<i32>} : memref<16x2xf32, #tpu.memory_space<vmem>>, vector<16x2xf32>,
    return
  }
  func.func @transform_0(%arg0: i32) -> (i32, i32) {
    %c0_i32 = arith.constant 0 : i32
    %c0_i32_0 = arith.constant 0 : i32
    return %arg0, %c0_i32 : i32, i32
  }
  func.func @transform_1(%arg0: i32) -> (i32, i32) {
    %c0_i32 = arith.constant 0 : i32
    %c0_i32_0 = arith.constant 0 : i32
    %c0_i32_1 = arith.constant 0 : i32
    return %c0_i32, %c0_i32_0 : i32, i32
  }
  func.func @transform_2(%arg0: i32) -> (i32, i32) {
    %c0_i32 = arith.constant 0 : i32
    %c0_i32_0 = arith.constant 0 : i32
    %c0_i32_1 = arith.constant 0 : i32
    return %c0_i32, %c0_i32_0 : i32, i32
  }
  func.func @transform_3(%arg0: i32) -> (i32, i32) {
    %c0_i32 = arith.constant 0 : i32
    %c0_i32_0 = arith.constant 0 : i32
    %c0_i32_1 = arith.constant 0 : i32
    return %c0_i32, %c0_i32_0 : i32, i32
  }
  func.func @transform_4(%arg0: i32) -> (i32, i32) {
    %c0_i32 = arith.constant 0 : i32
    %c0_i32_0 = arith.constant 0 : i32
    %c0_i32_1 = arith.constant 0 : i32
    return %c0_i32, %c0_i32_0 : i32, i32
  }
  func.func @transform_5(%arg0: i32) -> (i32, i32, i32) {
    %c0_i32 = arith.constant 0 : i32
    %c0_i32_0 = arith.constant 0 : i32
    %c0_i32_1 = arith.constant 0 : i32
    %c0_i32_2 = arith.constant 0 : i32
    return %c0_i32, %c0_i32_0, %c0_i32_1 : i32, i32, i32
  }
  func.func @transform_6(%arg0: i32) -> (i32, i32) {
    %c0_i32 = arith.constant 0 : i32
    %c0_i32_0 = arith.constant 0 : i32
    %c0_i32_1 = arith.constant 0 : i32
    return %c0_i32, %c0_i32_0 : i32, i32
  }
  func.func @transform_7(%arg0: i32) -> (i32, i32) {
    %c0_i32 = arith.constant 0 : i32
    %c0_i32_0 = arith.constant 0 : i32
    %c0_i32_1 = arith.constant 0 : i32
    return %c0_i32, %c0_i32_0 : i32, i32
  }
  func.func @transform_8(%arg0: i32) -> (i32, i32) {
    %c0_i32 = arith.constant 0 : i32
    %c0_i32_0 = arith.constant 0 : i32
    %c0_i32_1 = arith.constant 0 : i32
    return %c0_i32, %c0_i32_0 : i32, i32
  }
  func.func @transform_9(%arg0: i32) -> (i32, i32) {
    %c0_i32 = arith.constant 0 : i32
    %c0_i32_0 = arith.constant 0 : i32
    return %arg0, %c0_i32 : i32, i32
  }
}

</mosaic_0001>

<bundles_post_ra>
// kernel: tile.8
= control target key start
LH: loop header
LB: loop body
LE: loop exit
PB: predicated region body
PF: predicated region fallthrough
CT: control target
= control target key end

     0   :  { %s28_s0 = inlined_call_operand.vmem [shape: f32[10], index: 0, kind: input, shape index: {}]   ;;  %s29_s1 = inlined_call_operand.vmem [shape: f32[15,10], index: 1, kind: output, shape index: {}]  }
   0x1   :  { %v4_v0 = vld [vmem:[%s28_s0] ss:$0 sm:$0xff] }
   0x2   :  { %5 = vst [vmem:[%s29_s1] sm:$0xff] %v4_v0  ;;  %8 = vst [vmem:[%s29_s1 + $0x8] sm:$0xff] %v4_v0 }

// kernel: tile.9
= control target key start
LH: loop header
LB: loop body
LE: loop exit
PB: predicated region body
PF: predicated region fallthrough
CT: control target
= control target key end

     0   :  { %vm9_vm0 = vcmask 64512   ;;  %s139_s10 = smov 100   ;;  %s140_s15 = smov 120   ;;  %vm3_vm1 = vcmask 80896   ;;  %vm13_vm2 = vcmask 15360   ;;  %vm16_vm3 = vcmask 1048512   ;;  %s217_s0 = inlined_call_operand.vmem [shape: f32[15,10], index: 0, kind: input, shape index: {}]   ;;  %s218_s1 = inlined_call_operand.vmem [shape: f32[1,150], index: 1, kind: output, shape index: {}]  }
   0x1   :  { %v112_v0 = vld [vmem:[%s217_s0 + $0xa] sm:$0x1]   ;;  %v109_v1 = vld [vmem:[%s217_s0 + $0xc] sm:$0x1]   ;;  %v113_v4 = vld [vmem:[%s217_s0 + $0x9] sm:$0x1]  }
   0x2   :  { %26 = vrot.lane.b32.xlu1 %v112_v0, %s139_s10  ;;  %v110_v2 = vld [vmem:[%s217_s0 + $0xc] sm:$0x1]   ;;  %v111_v5 = vld [vmem:[%s217_s0 + $0xb] sm:$0x1]   ;;  %s141_s18 = smov 90   ;;  %s142_s21 = smov 110  }
   0x3   :  { %v10_v3 = vsel %vm9_vm0, %v110_v2, %v109_v1  ;;  %v115_v6 = vld [vmem:[%s217_s0 + $0x7] sm:$0x1]   ;;  %v114_v7 = vld [vmem:[%s217_s0 + $0x8] sm:$0x1]   ;;  %v2_v8 = vld [vmem:[%s217_s0] sm:$0x1]  }
   0x4   :  { %11 = vrot.lane.b32.xlu0 %v10_v3, %s140_s15  ;;  %s143_s26 = smov 70   ;;  %4 = vst.msk [vmem:[#allocation0] sm:$0x1] %vm3_vm1, %v2_v8   ;;  %v117_v9 = vld [vmem:[%s217_s0 + $0x5] sm:$0x1]   ;;  %s144_s29 = smov 80  }
   0x5   :  { %v116_v10 = vld [vmem:[%s217_s0 + $0x6] sm:$0x1]   ;;  %s145_s3 = smov 50   ;;  %v119_v11 = vld [vmem:[%s217_s0 + $0x3] sm:$0x1]   ;;  %s146_s6 = smov 60  }
   0x6   :  { %32 = vrot.lane.b32.xlu1 %v113_v4, %s141_s18  ;;  %v118_v12 = vld [vmem:[%s217_s0 + $0x4] sm:$0x1]   ;;  %s147_s9 = smov 30   ;;  %v121_v13 = vld [vmem:[%s217_s0 + $0xe] sm:$0x1]   ;;  %s148_s12 = smov 40  }
   0x7   :  { %v120_v14 = vld [vmem:[%s217_s0 + $0x2] sm:$0x1]   ;;  %s149_s15 = smov 12   ;;  %v123_v15 = vld [vmem:[%s217_s0 + $0xd] sm:$0x1]   ;;  %s150_s18 = smov 20  }
   0x8   :  { %20 = vrot.lane.b32.xlu0 %v111_v5, %s142_s21  ;;  %v122_v16 = vld [vmem:[%s217_s0 + $0x1] sm:$0x1]   ;;  %s151_s0 = smov 2   ;;  %s152_s21 = smov 10   ;;  %vm22_vm4 = vcmask 982896   ;;  %vm28_vm5 = vcmask 900896  }
   0x9   :  { %vm34_vm6 = vcmask 818896   ;;  %vm40_vm7 = vcmask 736896   ;;  %vm46_vm8 = vcmask 654896   ;;  %vm52_vm9 = vcmask 572896  }
   0xa   :  { %44 = vrot.lane.b32.xlu1 %v115_v6, %s143_s26  ;;  %vm58_vm10 = vcmask 490896   ;;  %vm64_vm11 = vcmask 408896   ;;  %vm70_vm12 = vcmask 326896   ;;  %vm82_vm13 = vcmask 179296  }
   0xb   :  { %vm76_vm14 = vcmask 244896   ;;  %vm95_vm15 = vcmask 97296   ;;  %vm89_vm0 = vcmask 162896  }
   0xc   :  { %38 = vrot.lane.b32.xlu0 %v114_v7, %s144_s29 }
   0xe   :  { %56 = vrot.lane.b32.xlu1 %v117_v9, %s145_s3 }
  0x10   :  { %50 = vrot.lane.b32.xlu0 %v116_v10, %s146_s6 }
  0x12   :  { %68 = vrot.lane.b32.xlu1 %v119_v11, %s147_s9 }
  0x14   :  { %62 = vrot.lane.b32.xlu0 %v118_v12, %s148_s12 }
  0x16   :  { %80 = vrot.lane.b32.xlu1 %v121_v13, %s149_s15 }
  0x18   :  { %74 = vrot.lane.b32.xlu0 %v120_v14, %s150_s18 }
  0x1a   :  { %93 = vrot.lane.b32.xlu1 %v123_v15, %s151_s0 }
  0x1c   :  { %87 = vrot.lane.b32.xlu0 %v122_v16, %s152_s21 }
  0x74   :  { %v27_v17 = vpop.permute.xlu1 %26  }
  0x76   :  { %v12_v18 = vpop.permute.xlu0 %11  }
  0x77   :  { %15 = vst.msk [vmem:[#allocation0 + $0x8] sm:$0x1] %vm13_vm2, %v12_v18  }
  0x78   :  { %17 = vst.msk [vmem:[#allocation0] sm:$0x1] %vm16_vm3, %v12_v18   ;;  %v33_v19 = vpop.permute.xlu1 %32  }
  0x7a   :  { %v21_v20 = vpop.permute.xlu0 %20  }
  0x7b   :  { %23 = vst.msk [vmem:[#allocation0] sm:$0x1] %vm22_vm4, %v21_v20  }
  0x7c   :  { %29 = vst.msk [vmem:[#allocation0] sm:$0x1] %vm28_vm5, %v27_v17   ;;  %v45_v21 = vpop.permute.xlu1 %44  }
  0x7d   :  { %35 = vst.msk [vmem:[#allocation0] sm:$0x1] %vm34_vm6, %v33_v19  }
  0x7e   :  { %v39_v22 = vpop.permute.xlu0 %38  }
  0x7f   :  { %41 = vst.msk [vmem:[#allocation0] sm:$0x1] %vm40_vm7, %v39_v22  }
  0x80   :  { %47 = vst.msk [vmem:[#allocation0] sm:$0x1] %vm46_vm8, %v45_v21   ;;  %v57_v23 = vpop.permute.xlu1 %56  }
  0x82   :  { %v51_v24 = vpop.permute.xlu0 %50  }
  0x83   :  { %53 = vst.msk [vmem:[#allocation0] sm:$0x1] %vm52_vm9, %v51_v24  }
  0x84   :  { %59 = vst.msk [vmem:[#allocation0] sm:$0x1] %vm58_vm10, %v57_v23   ;;  %v69_v25 = vpop.permute.xlu1 %68  }
  0x86   :  { %v63_v26 = vpop.permute.xlu0 %62  }
  0x87   :  { %65 = vst.msk [vmem:[#allocation0] sm:$0x1] %vm64_vm11, %v63_v26  }
  0x88   :  { %71 = vst.msk [vmem:[#allocation0] sm:$0x1] %vm70_vm12, %v69_v25   ;;  %v81_v27 = vpop.permute.xlu1 %80  }
  0x89   :  { %84 = vst.msk [vmem:[#allocation0 + $0x8] sm:$0x1] %vm82_vm13, %v81_v27  }
  0x8a   :  { %v75_v28 = vpop.permute.xlu0 %74  }
  0x8b   :  { %77 = vst.msk [vmem:[#allocation0] sm:$0x1] %vm76_vm14, %v75_v28  }
  0x8c   :  { %v94_v29 = vpop.permute.xlu1 %93  }
  0x8d   :  { %97 = vst.msk [vmem:[#allocation0 + $0x8] sm:$0x1] %vm95_vm15, %v94_v29  }
  0x8e   :  { %v88_v30 = vpop.permute.xlu0 %87  }
  0x8f   :  { %90 = vst.msk [vmem:[#allocation0] sm:$0x1] %vm89_vm0, %v88_v30  }
  0x94   :  { %v105_v31 = vld [vmem:[#allocation0 + $0x8] sm:$0x1] }
  0x95   :  { %124 = vst [vmem:[%s218_s1 + $0x1] sm:$0x1] %v105_v31 }
  0x96   :  { %v101_v32 = vld [vmem:[#allocation0] sm:$0x1] }
  0x97   :  { %103 = vst [vmem:[%s218_s1] sm:$0x1] %v101_v32 }

// kernel: net_nonsquare_forward.1
= control target key start
LH: loop header
LB: loop body
LE: loop exit
PB: predicated region body
PF: predicated region fallthrough
CT: control target
= control target key end

     0   :  { %v1537_v1 = vmov 0   ;;  %vm196_vm0 = vcmask 1043456   ;;  %vm177_vm1 = vcmask 982016   ;;  %vm434_vm2 = vcmask 1042432   ;;  %s1930_s1 = inlined_call_operand.vmem [shape: bf16[120,150], index: 1, kind: input, shape index: {}]   ;;  %s1931_s0 = inlined_call_operand.vmem [shape: bf16[96,120], index: 0, kind: input, shape index: {}]   ;;  %s1932_s3 = inlined_call_operand.vmem [shape: bf16[150,50], index: 3, kind: input, shape index: {}]   ;;  %s1933_s5 = inlined_call_operand.vmem [shape: bf16[6,50,100], index: 5, kind: input, shape index: {}]   ;;  %s1934_s2 = inlined_call_operand.vmem [shape: f32[1,150], index: 2, kind: input, shape index: {}]   ;;  %s1935_s4 = inlined_call_operand.vmem [shape: f32[1,50], index: 4, kind: input, shape index: {}]   ;;  %s1936_s7 = inlined_call_operand.vmem [shape: bf16[100,2], index: 7, kind: input, shape index: {}]   ;;  %s1937_s6 = inlined_call_operand.vmem [shape: f32[1,100], index: 6, kind: input, shape index: {}]   ;;  %s1938_s8 = inlined_call_operand.vmem [shape: f32[1,2], index: 8, kind: input, shape index: {}]   ;;  %s1939_s9 = inlined_call_operand.vmem [shape: f32[16,2], index: 9, kind: output, shape index: {}]  }
   0x1   :  { %v1387_v0 = vld [vmem:[%s1930_s1 + $0x4] ss:$8 sps:$4 sm:$0xff]   ;;  %235 = vmatprep.mubr.bf16.mxu0 %v1537_v1  ;;  %438 = vmatprep.subr.bf16.mxu1 %v1537_v1  ;;  %v1389_v2 = vld [vmem:[%s1930_s1] ss:$8 sps:$4 sm:$0xff]   ;;  %v1390_v3 = vld [vmem:[%s1930_s1 + $0x14] ss:$8 sps:$4 sm:$0xff]   ;;  %v62_v37 = vlaneseq }
   0x2   :  { %203 = vmatprep.subr.bf16.mxu0 %v1387_v0  ;;  %v1392_v4 = vld [vmem:[%s1930_s1 + $0x10] ss:$8 sps:$4 sm:$0xff]   ;;  %v1393_v5 = vld [vmem:[%s1930_s1 + $0x24] ss:$8 sps:$4 sm:$0xff]   ;;  %v1395_v6 = vld [vmem:[%s1930_s1 + $0x20] ss:$8 sps:$4 sm:$0xff]  }
   0x3   :  { %204 = vmatpush1.bf16.msra.mxu0 %v1389_v2  ;;  %v1396_v7 = vld [vmem:[%s1930_s1 + $0x34] ss:$8 sps:$4 sm:$0xff]   ;;  %v1398_v8 = vld [vmem:[%s1930_s1 + $0x30] ss:$8 sps:$4 sm:$0xff]   ;;  %v1399_v9 = vld [vmem:[%s1930_s1 + $0x44] ss:$8 sps:$4 sm:$0xff]  }
   0x4   :  { %205 = vmatprep.subr.bf16.mxu0 %v1390_v3  ;;  %v1401_v10 = vld [vmem:[%s1930_s1 + $0x40] ss:$8 sps:$4 sm:$0xff]   ;;  %v1402_v11 = vld [vmem:[%s1930_s1 + $0x54] ss:$8 sps:$4 sm:$0xff]   ;;  %v1404_v13 = vld [vmem:[%s1930_s1 + $0x50] ss:$8 sps:$4 sm:$0xff]  }
   0x5   :  { %v1416_v12 = vld [vmem:[%s1932_s3] sm:$0xff]   ;;  %v1417_v14 = vld [vmem:[%s1932_s3 + $0x8] sm:$0xff]   ;;  %v59_v16 = vld [vmem:[%s1930_s1 + $0x70] sm:$0xff]  ;;  %v1538_v36 = vmov 0.0   ;;  %v63_v38 = vshrl.u32 %v62_v37, 7  ;;  %vm415_vm3 = vcmask 179200  }
   0x6   :  { %439 = vmatpush1.bf16.msra.mxu1 %v1416_v12  ;;  %v1405_v15 = vld [vmem:[%s1930_s1 + $0x64] ss:$8 sps:$4 sm:$0xff]   ;;  %v1418_v17 = vld [vmem:[%s1932_s3 + $0x10] sm:$0xff]   ;;  %v1407_v18 = vld [vmem:[%s1930_s1 + $0x60] ss:$8 sps:$4 sm:$0xff]   ;;  %v1156_v19 = vcombine.high %v59_v16, %v59_v16  ;;  %v1155_v20 = vcombine.low %v59_v16, %v59_v16  ;;  %vm577_vm4 = vcmask 1040384  }
   0x7   :  { %206 = vmatpush1.bf16.msra.mxu0 %v1392_v4  ;;  %440 = vmatprep.subr.bf16.mxu1 %v1537_v1  ;;  %v1419_v21 = vld [vmem:[%s1932_s3 + $0x18] sm:$0xff]   ;;  %v1410_v23 = vld [vmem:[%s1931_s0] sm:$0xff]   ;;  %v1411_v25 = vld [vmem:[%s1931_s0 + $0x8] sm:$0xff]   ;;  %v64_v39 = vsub.s32 0, %v63_v38  ;;  %v68_v41 = vsub.s32 1, %v63_v38  ;;  %vm1539_vm5 = vmmov 0  }
   0x8   :  { %207 = vmatprep.subr.bf16.mxu0 %v1393_v5  ;;  %v198_v22 = vsel %vm196_vm0, %v1155_v20, 0  ;;  %v1420_v24 = vld [vmem:[%s1932_s3 + $0x20] sm:$0xff]   ;;  %v1412_v26 = vld [vmem:[%s1931_s0 + $0x10] sm:$0xff]   ;;  %v1413_v27 = vld [vmem:[%s1931_s0 + $0x18] sm:$0xff]   ;;  %vm573_vm6 = vcmask 408576   ;;  %vm1077_vm7 = vcmask 1041408  }
   0x9   :  { %v1414_v28 = vld [vmem:[%s1931_s0 + $0x20] sm:$0xff]   ;;  %v1415_v29 = vld [vmem:[%s1931_s0 + $0x28] sm:$0xff]   ;;  %v1422_v31 = vld [vmem:[%s1932_s3 + $0x30] sm:$0xff]   ;;  %vm1073_vm8 = vcmask 818176   ;;  %vm1128_vm9 = vcmask 15360  }
   0xa   :  { %441 = vmatpush1.bf16.msra.mxu1 %v1417_v14  ;;  %v1421_v30 = vld [vmem:[%s1932_s3 + $0x28] sm:$0xff]   ;;  %v1423_v32 = vld [vmem:[%s1932_s3 + $0x38] sm:$0xff]   ;;  %v1424_v33 = vld [vmem:[%s1932_s3 + $0x40] sm:$0xff]  }
   0xb   :  { %208 = vmatpush1.bf16.msra.mxu0 %v1395_v6  ;;  %442 = vmatprep.subr.bf16.mxu1 %v1537_v1  ;;  %v1425_v34 = vld [vmem:[%s1932_s3 + $0x48] ss:$0 sps:$4 sm:$0x77]   ;;  %v60_v40 = vld [vmem:[%s1934_s2] sm:$0x3] }
   0xc   :  { %209 = vmatprep.subr.bf16.mxu0 %v1396_v7  ;;  %v436_v35 = vsel %vm434_vm2, %v1425_v34, 0  ;;  %v1710_v42 = vrot.slane %v60_v40, %v64_v39  ;;  %v1712_v43 = vrot.slane %v60_v40, %v68_v41  ;;  %v1426_v5 = vld [vmem:[%s1933_s5 + $0x1c] sm:$0xff]   ;;  %v1427_v12 = vld [vmem:[%s1933_s5 + $0x24] sm:$0xff]  }
   0xe   :  { %443 = vmatpush1.bf16.msra.mxu1 %v1418_v17 }
   0xf   :  { %210 = vmatpush1.bf16.msra.mxu0 %v1398_v8  ;;  %444 = vmatprep.subr.bf16.mxu1 %v1537_v1 }
  0x10   :  { %211 = vmatprep.subr.bf16.mxu0 %v1399_v9 }
  0x12   :  { %445 = vmatpush1.bf16.msra.mxu1 %v1419_v21 }
  0x13   :  { %212 = vmatpush1.bf16.msra.mxu0 %v1401_v10  ;;  %446 = vmatprep.subr.bf16.mxu1 %v1537_v1 }
  0x14   :  { %213 = vmatprep.subr.bf16.mxu0 %v1402_v11 }
  0x16   :  { %447 = vmatpush1.bf16.msra.mxu1 %v1420_v24 }
  0x17   :  { %214 = vmatpush1.bf16.msra.mxu0 %v1404_v13  ;;  %448 = vmatprep.subr.bf16.mxu1 %v1537_v1 }
  0x18   :  { %215 = vmatprep.subr.bf16.mxu0 %v1405_v15 }
  0x1a   :  { %449 = vmatpush1.bf16.msra.mxu1 %v1421_v30 }
  0x1b   :  { %216 = vmatpush1.bf16.msra.mxu0 %v1407_v18  ;;  %450 = vmatprep.subr.bf16.mxu1 %v1537_v1 }
  0x1c   :  { %1157 = vmatprep.subr.msk.bf16.mxu0 %vm196_vm0, %v1156_v19 }
  0x1e   :  { %451 = vmatpush1.bf16.msra.mxu1 %v1422_v31 }
  0x1f   :  { %218 = vmatpush1.bf16.msra.mxu0 %v198_v22  ;;  %452 = vmatprep.subr.bf16.mxu1 %v1537_v1 }
  0x20   :  { %1318 = vmatprep.subr.bf16.mxu0 %v1538_v36 }
  0x22   :  { %1158 = vmatmul.mubr.msk.bf16.vlgmr.msra.gmra.mrb[0].mxu0 %vm177_vm1, %v1410_v23  ;;  %453 = vmatpush1.bf16.msra.mxu1 %v1423_v32 }
  0x23   :  { %245 = vmatprep.mubr.bf16.mxu0 %v1537_v1  ;;  %454 = vmatprep.subr.bf16.mxu1 %v1537_v1 }
  0x26   :  { %455 = vmatpush1.bf16.msra.mxu1 %v1424_v33 }
  0x27   :  { %456 = vmatprep.subr.bf16.mxu1 %v1537_v1 }
  0x2a   :  { %1159 = vmatmul.mubr.msk.bf16.gmra.mrb[4].mxu0 %vm177_vm1, %v1411_v25  ;;  %457 = vmatpush1.bf16.msra.mxu1 %v436_v35 }
  0x2b   :  { %255 = vmatprep.mubr.bf16.mxu0 %v1537_v1  ;;  %1294 = vmatprep.subr.bf16.mxu1 %v1538_v36 }
  0x32   :  { %1160 = vmatmul.mubr.msk.bf16.gmra.mrb[8].mxu0 %vm177_vm1, %v1412_v26 }
  0x33   :  { %265 = vmatprep.mubr.bf16.mxu0 %v1537_v1 }
  0x3a   :  { %1161 = vmatmul.mubr.msk.bf16.gmra.mrb[12].mxu0 %vm177_vm1, %v1413_v27 }
  0x3b   :  { %275 = vmatprep.mubr.bf16.mxu0 %v1537_v1 }
  0x42   :  { %1162 = vmatmul.mubr.msk.bf16.gmra.mrb[16].mxu0 %vm177_vm1, %v1414_v28 }
  0x43   :  { %285 = vmatprep.mubr.bf16.mxu0 %v1537_v1 }
  0x4a   :  { %1163 = vmatmul.mubr.msk.bf16.gmra.mrb[20].mxu0 %vm177_vm1, %v1415_v29 }
  0x4b   :  { %1326 = vmatprep.mubr.msk.bf16.mxu0 %vm1539_vm5, %v1538_v36 }
  0xf5   :  { %v237_v44 = vpop.f32.mrb[0].mxu0 }
  0xf6   :  { %v238_v45 = vadd.f32 %v237_v44, %v1710_v42  ;;  %v239_v46 = vpop.f32.mrb[1].mxu0 }
  0xf7   :  { %v240_v47 = vadd.f32 %v239_v46, %v1712_v43  ;;  %v241_v48 = vpop.f32.mrb[2].mxu0 }
  0xf8   :  { %1457 = vtanh.f32 %v238_v45  ;;  %v242_v49 = vadd.f32 %v241_v48, %v1710_v42  ;;  %v243_v50 = vpop.f32.mrb[3].mxu0 }
  0xf9   :  { %1459 = vtanh.f32 %v240_v47  ;;  %v244_v51 = vadd.f32 %v243_v50, %v1712_v43 }
  0xfa   :  { %1461 = vtanh.f32 %v242_v49 }
  0xfb   :  { %1463 = vtanh.f32 %v244_v51 }
  0xfd   :  { %v247_v52 = vpop.f32.mrb[4].mxu0 }
  0xfe   :  { %v248_v53 = vadd.f32 %v247_v52, %v1710_v42  ;;  %v249_v54 = vpop.f32.mrb[5].mxu0 }
  0xff   :  { %v250_v55 = vadd.f32 %v249_v54, %v1712_v43  ;;  %v251_v56 = vpop.f32.mrb[6].mxu0 }
 0x100   :  { %1465 = vtanh.f32 %v248_v53  ;;  %v252_v57 = vadd.f32 %v251_v56, %v1710_v42  ;;  %v253_v58 = vpop.f32.mrb[7].mxu0 }
 0x101   :  { %1467 = vtanh.f32 %v250_v55  ;;  %v254_v59 = vadd.f32 %v253_v58, %v1712_v43 }
 0x102   :  { %v1458_v60 = vpop.eup %1457  ;;  %1469 = vtanh.f32 %v252_v57 }
 0x103   :  { %v1460_v61 = vpop.eup %1459  ;;  %1471 = vtanh.f32 %v254_v59 }
 0x104   :  { %v1462_v62 = vpop.eup %1461 }
 0x105   :  { %v1464_v63 = vpop.eup %1463  ;;  %v320_v0 = vpack.c.bf16 %v1462_v62, %v1458_v60  ;;  %v257_v1 = vpop.f32.mrb[8].mxu0 }
 0x106   :  { %v321_v2 = vpack.c.bf16 %v1464_v63, %v1460_v61  ;;  %v258_v3 = vadd.f32 %v257_v1, %v1710_v42  ;;  %v259_v4 = vpop.f32.mrb[9].mxu0 }
 0x107   :  { %v260_v6 = vadd.f32 %v259_v4, %v1712_v43  ;;  %v261_v7 = vpop.f32.mrb[10].mxu0  ;;  %v1429_v4 = vld [vmem:[%s1933_s5 + $0x38] sm:$0xff]  }
 0x108   :  { %1175 = vmatprep.mubr.msk.bf16.mxu1 %vm415_vm3, %v321_v2  ;;  %1473 = vtanh.f32 %v258_v3  ;;  %v262_v8 = vadd.f32 %v261_v7, %v1710_v42  ;;  %v263_v9 = vpop.f32.mrb[11].mxu0  ;;  %1319 = vmatpush3.bf16.msra.mxu0 %v1429_v4  ;;  %v1431_v7 = vld [vmem:[%s1933_s5 + $0x40] sm:$0xff]  }
 0x109   :  { %471 = vmatmul.mubr.bf16.vlgmr.msra.gmra.mrb[0].mxu1 %v320_v0  ;;  %1475 = vtanh.f32 %v260_v6  ;;  %v264_v10 = vadd.f32 %v263_v9, %v1712_v43  ;;  %1320 = vmatprep.subr.bf16.mxu0 %v1538_v36  ;;  %v1436_v9 = vld [vmem:[%s1933_s5 + $0x50] ss:$0 sps:$4 sm:$0x11]  }
 0x10a   :  { %v1466_v11 = vpop.eup %1465  ;;  %1477 = vtanh.f32 %v262_v8  ;;  %1295 = vmatpush3.bf16.msra.mxu1 %v1426_v5  ;;  %v1430_v5 = vld [vmem:[%s1933_s5 + $0x34] ss:$0 sps:$4 sm:$0x11]   ;;  %v1434_v8 = vld [vmem:[%s1933_s5 + $0x48] sm:$0xff]  }
 0x10b   :  { %v1468_v13 = vpop.eup %1467  ;;  %1479 = vtanh.f32 %v264_v10  ;;  %1296 = vmatprep.subr.bf16.mxu1 %v1538_v36  ;;  %v579_v6 = vsel %vm577_vm4, %v1430_v5, 0  ;;  %v723_v10 = vsel %vm577_vm4, %v1436_v9, 0  ;;  %v1441_v5 = vld [vmem:[%s1933_s5 + $0x5c] sm:$0xff]  }
 0x10c   :  { %v1470_v14 = vpop.eup %1469  ;;  %1321 = vmatpush3.bf16.msra.mxu0 %v1431_v7 }
 0x10d   :  { %v1472_v15 = vpop.eup %1471  ;;  %v322_v16 = vpack.c.bf16 %v1470_v14, %v1466_v11  ;;  %v267_v17 = vpop.f32.mrb[12].mxu0  ;;  %1322 = vmatprep.subr.bf16.mxu0 %v1538_v36  ;;  %v1785_v11 = vld [vmem:[%s1935_s4] ss:$0 sm:$0xff] }
 0x10e   :  { %v323_v18 = vpack.c.bf16 %v1472_v15, %v1468_v13  ;;  %v268_v19 = vadd.f32 %v267_v17, %v1710_v42  ;;  %v269_v20 = vpop.f32.mrb[13].mxu0  ;;  %1297 = vmatpush3.bf16.msra.mxu1 %v1427_v12 }
 0x10f   :  { %v270_v21 = vadd.f32 %v269_v20, %v1712_v43  ;;  %v271_v22 = vpop.f32.mrb[14].mxu0  ;;  %1298 = vmatprep.subr.bf16.mxu1 %v1538_v36 }
 0x110   :  { %1176 = vmatprep.mubr.msk.bf16.mxu1 %vm415_vm3, %v323_v18  ;;  %1481 = vtanh.f32 %v268_v19  ;;  %v272_v23 = vadd.f32 %v271_v22, %v1710_v42  ;;  %v273_v24 = vpop.f32.mrb[15].mxu0  ;;  %1323 = vmatpush3.bf16.msra.mxu0 %v1434_v8 }
 0x111   :  { %479 = vmatmul.mubr.bf16.gmra.mrb[4].mxu1 %v322_v16  ;;  %1483 = vtanh.f32 %v270_v21  ;;  %v274_v25 = vadd.f32 %v273_v24, %v1712_v43  ;;  %1324 = vmatprep.subr.bf16.mxu0 %v1538_v36 }
 0x112   :  { %v1474_v26 = vpop.eup %1473  ;;  %1485 = vtanh.f32 %v272_v23 }
 0x113   :  { %v1476_v27 = vpop.eup %1475  ;;  %1487 = vtanh.f32 %v274_v25 }
 0x114   :  { %v1478_v28 = vpop.eup %1477  ;;  %1325 = vmatpush3.bf16.msra.mxu0 %v723_v10 }
 0x115   :  { %v1480_v29 = vpop.eup %1479  ;;  %v277_v30 = vpop.f32.mrb[16].mxu0  ;;  %v324_v31 = vpack.c.bf16 %v1478_v28, %v1474_v26  ;;  %1342 = vmatprep.subr.bf16.mxu0 %v1538_v36 }
 0x116   :  { %v278_v32 = vadd.f32 %v277_v30, %v1710_v42  ;;  %v279_v33 = vpop.f32.mrb[17].mxu0  ;;  %v325_v34 = vpack.c.bf16 %v1480_v29, %v1476_v27 }
 0x117   :  { %v280_v35 = vadd.f32 %v279_v33, %v1712_v43  ;;  %v281_v37 = vpop.f32.mrb[18].mxu0 }
 0x118   :  { %1489 = vtanh.f32 %v278_v32  ;;  %v282_v38 = vadd.f32 %v281_v37, %v1710_v42  ;;  %v283_v39 = vpop.f32.mrb[19].mxu0  ;;  %1177 = vmatprep.mubr.msk.bf16.mxu1 %vm415_vm3, %v325_v34 }
 0x119   :  { %1491 = vtanh.f32 %v280_v35  ;;  %v284_v40 = vadd.f32 %v283_v39, %v1712_v43  ;;  %487 = vmatmul.mubr.bf16.gmra.mrb[8].mxu1 %v324_v31  ;;  %v1432_v35 = vld [vmem:[%s1933_s5] sm:$0xff]  }
 0x11a   :  { %v1482_v41 = vpop.eup %1481  ;;  %1493 = vtanh.f32 %v282_v38 }
 0x11b   :  { %v1484_v44 = vpop.eup %1483  ;;  %1495 = vtanh.f32 %v284_v40 }
 0x11c   :  { %v1486_v45 = vpop.eup %1485 }
 0x11d   :  { %v1488_v46 = vpop.eup %1487  ;;  %v287_v47 = vpop.f32.mrb[20].mxu0  ;;  %v326_v48 = vpack.c.bf16 %v1486_v45, %v1482_v41 }
 0x11e   :  { %v288_v49 = vadd.f32 %v287_v47, %v1710_v42  ;;  %v289_v50 = vpop.f32.mrb[21].mxu0  ;;  %v327_v51 = vpack.c.bf16 %v1488_v46, %v1484_v44  ;;  %v1433_v44 = vld [vmem:[%s1933_s5 + $0x8] sm:$0xff]  }
 0x11f   :  { %v290_v52 = vadd.f32 %v289_v50, %v1712_v43  ;;  %v291_v53 = vpop.f32.mrb[22].mxu0  ;;  %v1438_v50 = vld [vmem:[%s1933_s5 + $0x70] sm:$0xff]  }
 0x120   :  { %1497 = vtanh.f32 %v288_v49  ;;  %1178 = vmatprep.mubr.msk.bf16.mxu1 %vm415_vm3, %v327_v51  ;;  %v292_v54 = vadd.f32 %v291_v53, %v1710_v42  ;;  %v293_v55 = vpop.f32.mrb[23].mxu0  ;;  %v1435_v49 = vld [vmem:[%s1933_s5 + $0x10] sm:$0xff]   ;;  %v1437_v53 = vld [vmem:[%s1933_s5 + $0x18] ss:$0 sps:$4 sm:$0x11]  }
 0x121   :  { %1499 = vtanh.f32 %v290_v52  ;;  %495 = vmatmul.mubr.bf16.gmra.mrb[12].mxu1 %v326_v48  ;;  %v294_v56 = vadd.f32 %v293_v55, %v1712_v43  ;;  %v1428_v43 = vld [vmem:[%s1933_s5 + $0x2c] sm:$0xff]  }
 0x122   :  { %v1490_v57 = vpop.eup %1489  ;;  %1501 = vtanh.f32 %v292_v54  ;;  %1299 = vmatpush3.bf16.msra.mxu1 %v1428_v43 }
 0x123   :  { %v1492_v58 = vpop.eup %1491  ;;  %1503 = vtanh.f32 %v294_v56  ;;  %1300 = vmatprep.subr.bf16.mxu1 %v1538_v36 }
 0x124   :  { %v1494_v59 = vpop.eup %1493 }
 0x125   :  { %v1496_v60 = vpop.eup %1495  ;;  %v328_v61 = vpack.c.bf16 %v1494_v59, %v1490_v57  ;;  %v1440_v59 = vld [vmem:[%s1933_s5 + $0x78] sm:$0xff]  }
 0x126   :  { %v329_v62 = vpack.c.bf16 %v1496_v60, %v1492_v58  ;;  %1301 = vmatpush3.bf16.msra.mxu1 %v579_v6  ;;  %v647_v60 = vsel %vm577_vm4, %v1437_v53, 0 }
 0x127   :  { %1306 = vmatprep.subr.bf16.mxu1 %v1538_v36 }
 0x128   :  { %1179 = vmatprep.mubr.msk.bf16.mxu1 %vm415_vm3, %v329_v62 }
 0x129   :  { %503 = vmatmul.mubr.bf16.gmra.mrb[16].mxu1 %v328_v61 }
 0x12a   :  { %v1498_v63 = vpop.eup %1497 }
 0x12b   :  { %v1500_v0 = vpop.eup %1499 }
 0x12c   :  { %v1502_v1 = vpop.eup %1501 }
 0x12d   :  { %v1504_v42 = vpop.eup %1503  ;;  %v330_v2 = vpack.c.bf16 %v1502_v1, %v1498_v63  ;;  %v1439_v63 = vld [vmem:[%s1933_s5 + $0x54] sm:$0xff]  }
 0x12e   :  { %v331_v3 = vpack.c.bf16 %v1504_v42, %v1500_v0  ;;  %v1442_v0 = vld [vmem:[%s1933_s5 + $0x80] sm:$0xff]   ;;  %v1444_v42 = vld [vmem:[%s1933_s5 + $0x88] ss:$0 sps:$4 sm:$0x11]  }
 0x12f   :  { %v879_v8 = vsel %vm577_vm4, %v1444_v42, 0 }
 0x130   :  { %1180 = vmatprep.mubr.msk.bf16.mxu1 %vm415_vm3, %v331_v3 }
 0x131   :  { %511 = vmatmul.mubr.bf16.gmra.mrb[20].mxu1 %v330_v2 }
 0x132   :  { %1302 = vmatprep.mubr.msk.bf16.mxu1 %vm1539_vm5, %v1538_v36 }
 0x1dc   :  { %v472_v12 = vpop.f32.mrb[0].mxu1 }
 0x1dd   :  { %v473_v13 = vadd.f32 %v1785_v11, %v472_v12  ;;  %v474_v14 = vpop.f32.mrb[1].mxu1  ;;  %v1443_v12 = vld [vmem:[%s1933_s5 + $0x64] sm:$0xff]  }
 0x1de   :  { %v475_v15 = vpop.f32.mrb[2].mxu1 }
 0x1df   :  { %v476_v16 = vadd.f32 %v1785_v11, %v475_v15  ;;  %v477_v17 = vpop.f32.mrb[3].mxu1  ;;  %1505 = vtanh.f32 %v473_v13 }
 0x1e0   :  { %v1446_v17 = vld [vmem:[%s1933_s5 + $0x8c] sm:$0xff]  }
 0x1e1   :  { %1507 = vtanh.f32 %v476_v16 }
 0x1e4   :  { %v480_v18 = vpop.f32.mrb[4].mxu1 }
 0x1e5   :  { %v481_v19 = vadd.f32 %v1785_v11, %v480_v18  ;;  %v482_v20 = vpop.f32.mrb[5].mxu1 }
 0x1e6   :  { %v483_v21 = vpop.f32.mrb[6].mxu1  ;;  %v1448_v20 = vld [vmem:[%s1933_s5 + $0x9c] sm:$0xff]  }
 0x1e7   :  { %v484_v22 = vadd.f32 %v1785_v11, %v483_v21  ;;  %v485_v23 = vpop.f32.mrb[7].mxu1  ;;  %1509 = vtanh.f32 %v481_v19  ;;  %v1447_v19 = vld [vmem:[%s1933_s5 + $0x94] sm:$0xff]   ;;  %v1449_v21 = vld [vmem:[%s1933_s5 + $0xa4] ss:$0 sps:$4 sm:$0x11]  }
 0x1e8   :  { %v1450_v23 = vld [vmem:[%s1936_s7] sm:$0xff]  }
 0x1e9   :  { %1511 = vtanh.f32 %v484_v22  ;;  %v1791_v24 = vpop.eup %1505  ;;  %v957_v22 = vsel %vm577_vm4, %v1449_v21, 0 }
 0x1eb   :  { %v1793_v25 = vpop.eup %1507 }
 0x1ec   :  { %v488_v26 = vpop.f32.mrb[8].mxu1  ;;  %v531_v27 = vpack.c.bf16 %v1793_v25, %v1791_v24  ;;  %v1451_v24 = vld [vmem:[%s1936_s7 + $0x8] sm:$0xff]   ;;  %v1452_v25 = vld [vmem:[%s1936_s7 + $0x10] sm:$0xff]  }
 0x1ed   :  { %v489_v28 = vadd.f32 %v1785_v11, %v488_v26  ;;  %v490_v29 = vpop.f32.mrb[9].mxu1  ;;  %v1453_v26 = vld [vmem:[%s1936_s7 + $0x18] sm:$0xff]  }
 0x1ee   :  { %v491_v30 = vpop.f32.mrb[10].mxu1  ;;  %v1456_v29 = vld [vmem:[%s1936_s7 + $0x30] ss:$0 sps:$4 sm:$0x33]  }
 0x1ef   :  { %1513 = vtanh.f32 %v489_v28  ;;  %v492_v31 = vadd.f32 %v1785_v11, %v491_v30  ;;  %v493_v32 = vpop.f32.mrb[11].mxu1  ;;  %v1455_v28 = vld [vmem:[%s1936_s7 + $0x28] sm:$0xff]   ;;  %v1079_v30 = vsel %vm1077_vm7, %v1456_v29, 0 }
 0x1f1   :  { %1515 = vtanh.f32 %v492_v31  ;;  %v1510_v33 = vpop.eup %1509 }
 0x1f3   :  { %v1512_v34 = vpop.eup %1511 }
 0x1f4   :  { %v532_v37 = vpack.c.bf16 %v1512_v34, %v1510_v33  ;;  %v496_v38 = vpop.f32.mrb[12].mxu1 }
 0x1f5   :  { %v497_v39 = vadd.f32 %v1785_v11, %v496_v38  ;;  %v498_v40 = vpop.f32.mrb[13].mxu1 }
 0x1f6   :  { %1303 = vmatmul.mubr.msk.bf16.vlgmr.msra.gmra.mrb[24].mxu1 %vm573_vm6, %v532_v37  ;;  %v499_v41 = vpop.f32.mrb[14].mxu1 }
 0x1f7   :  { %1307 = vmatpush3.bf16.msra.mxu1 %v1432_v35  ;;  %1517 = vtanh.f32 %v497_v39  ;;  %v500_v45 = vadd.f32 %v1785_v11, %v499_v41  ;;  %v501_v46 = vpop.f32.mrb[15].mxu1  ;;  %1314 = vmatprep.mubr.msk.bf16.mxu1 %vm1539_vm5, %v1538_v36 }
 0x1f8   :  { %1308 = vmatprep.subr.bf16.mxu1 %v1538_v36 }
 0x1f9   :  { %v1514_v47 = vpop.eup %1513  ;;  %1519 = vtanh.f32 %v500_v45 }
 0x1fb   :  { %v1516_v48 = vpop.eup %1515  ;;  %1309 = vmatpush3.bf16.msra.mxu1 %v1433_v44 }
 0x1fc   :  { %v533_v51 = vpack.c.bf16 %v1516_v48, %v1514_v47  ;;  %1310 = vmatprep.subr.bf16.mxu1 %v1538_v36  ;;  %v504_v52 = vpop.f32.mrb[16].mxu1 }
 0x1fd   :  { %v505_v54 = vadd.f32 %v1785_v11, %v504_v52  ;;  %v506_v55 = vpop.f32.mrb[17].mxu1 }
 0x1fe   :  { %v507_v56 = vpop.f32.mrb[18].mxu1  ;;  %1327 = vmatmul.mubr.msk.bf16.vlgmr.msra.gmra.mrb[24].mxu0 %vm573_vm6, %v533_v51 }
 0x1ff   :  { %1311 = vmatpush3.bf16.msra.mxu1 %v1435_v49  ;;  %1521 = vtanh.f32 %v505_v54  ;;  %v508_v57 = vadd.f32 %v1785_v11, %v507_v56  ;;  %1343 = vmatpush3.bf16.msra.mxu0 %v1438_v50  ;;  %v509_v58 = vpop.f32.mrb[19].mxu1 }
 0x200   :  { %1312 = vmatprep.subr.bf16.mxu1 %v1538_v36  ;;  %1344 = vmatprep.subr.bf16.mxu0 %v1538_v36 }
 0x201   :  { %v1518_v61 = vpop.eup %1517  ;;  %1523 = vtanh.f32 %v508_v57  ;;  %1350 = vmatprep.mubr.msk.bf16.mxu0 %vm1539_vm5, %v1538_v36 }
 0x203   :  { %v1520_v62 = vpop.eup %1519  ;;  %1313 = vmatpush3.bf16.msra.mxu1 %v647_v60  ;;  %1345 = vmatpush3.bf16.msra.mxu0 %v1440_v59 }
 0x204   :  { %1330 = vmatprep.subr.bf16.mxu1 %v1538_v36  ;;  %v512_v1 = vpop.f32.mrb[20].mxu1  ;;  %1346 = vmatprep.subr.bf16.mxu0 %v1538_v36  ;;  %v534_v2 = vpack.c.bf16 %v1520_v62, %v1518_v61  ;;  %v1246_v62 = vld [vmem:[%s1937_s6] ss:$0 sm:$0xff] }
 0x205   :  { %v513_v3 = vadd.f32 %v1785_v11, %v512_v1  ;;  %v514_v43 = vpop.f32.mrb[21].mxu1 }
 0x206   :  { %1315 = vmatmul.mubr.msk.bf16.vlgmr.msra.gmra.mrb[28].mxu1 %vm573_vm6, %v531_v27  ;;  %v515_v4 = vpop.f32.mrb[22].mxu1  ;;  %v1454_v27 = vld [vmem:[%s1936_s7 + $0x20] sm:$0xff]  }
 0x207   :  { %1331 = vmatpush3.bf16.msra.mxu1 %v1439_v63  ;;  %1525 = vtanh.f32 %v513_v3  ;;  %1347 = vmatpush3.bf16.msra.mxu0 %v1442_v0  ;;  %v516_v6 = vadd.f32 %v1785_v11, %v515_v4  ;;  %v517_v7 = vpop.f32.mrb[23].mxu1  ;;  %v1445_v11 = vld [vmem:[%s1933_s5 + $0x6c] ss:$0 sps:$4 sm:$0x11]  }
 0x208   :  { %1332 = vmatprep.subr.bf16.mxu1 %v1538_v36  ;;  %1348 = vmatprep.subr.bf16.mxu0 %v1538_v36  ;;  %v801_v14 = vsel %vm577_vm4, %v1445_v11, 0  ;;  %v1247_v7 = vld [vmem:[%s1938_s8] ss:$0 sm:$0xff] }
 0x209   :  { %v1522_v9 = vpop.eup %1521  ;;  %1527 = vtanh.f32 %v516_v6  ;;  %1338 = vmatprep.mubr.msk.bf16.mxu1 %vm1539_vm5, %v1538_v36 }
 0x20b   :  { %v1524_v10 = vpop.eup %1523  ;;  %1333 = vmatpush3.bf16.msra.mxu1 %v1441_v5  ;;  %1349 = vmatpush3.bf16.msra.mxu0 %v879_v8 }
 0x20c   :  { %1334 = vmatprep.subr.bf16.mxu1 %v1538_v36  ;;  %v535_v13 = vpack.c.bf16 %v1524_v10, %v1522_v9  ;;  %1366 = vmatprep.subr.bf16.mxu0 %v1538_v36 }
 0x20e   :  { %1351 = vmatmul.mubr.msk.bf16.vlgmr.msra.gmra.mrb[28].mxu0 %vm573_vm6, %v535_v13 }
 0x20f   :  { %1335 = vmatpush3.bf16.msra.mxu1 %v1443_v12  ;;  %1380 = vmatprep.mubr.msk.bf16.mxu0 %vm1539_vm5, %v1538_v36 }
 0x210   :  { %1336 = vmatprep.subr.bf16.mxu1 %v1538_v36  ;;  %1367 = vmatpush3.bf16.msra.mxu0 %v1450_v23 }
 0x211   :  { %v1526_v15 = vpop.eup %1525  ;;  %1368 = vmatprep.subr.bf16.mxu0 %v1538_v36 }
 0x213   :  { %v1528_v16 = vpop.eup %1527  ;;  %1337 = vmatpush3.bf16.msra.mxu1 %v801_v14 }
 0x214   :  { %1354 = vmatprep.subr.bf16.mxu1 %v1538_v36  ;;  %v536_v18 = vpack.c.bf16 %v1528_v16, %v1526_v15  ;;  %1369 = vmatpush3.bf16.msra.mxu0 %v1451_v24 }
 0x215   :  { %1370 = vmatprep.subr.bf16.mxu0 %v1538_v36 }
 0x216   :  { %1339 = vmatmul.mubr.msk.bf16.vlgmr.msra.gmra.mrb[32].mxu1 %vm573_vm6, %v534_v2 }
 0x217   :  { %1355 = vmatpush3.bf16.msra.mxu1 %v1446_v17  ;;  %1362 = vmatprep.mubr.msk.bf16.mxu1 %vm1539_vm5, %v1538_v36 }
 0x218   :  { %1356 = vmatprep.subr.bf16.mxu1 %v1538_v36  ;;  %1371 = vmatpush3.bf16.msra.mxu0 %v1452_v25 }
 0x219   :  { %1372 = vmatprep.subr.bf16.mxu0 %v1538_v36 }
 0x21b   :  { %1357 = vmatpush3.bf16.msra.mxu1 %v1447_v19 }
 0x21c   :  { %1358 = vmatprep.subr.bf16.mxu1 %v1538_v36  ;;  %1373 = vmatpush3.bf16.msra.mxu0 %v1453_v26 }
 0x21d   :  { %1374 = vmatprep.subr.bf16.mxu0 %v1538_v36 }
 0x21f   :  { %1359 = vmatpush3.bf16.msra.mxu1 %v1448_v20 }
 0x220   :  { %1360 = vmatprep.subr.bf16.mxu1 %v1538_v36  ;;  %1375 = vmatpush3.bf16.msra.mxu0 %v1454_v27 }
 0x221   :  { %1376 = vmatprep.subr.bf16.mxu0 %v1538_v36 }
 0x223   :  { %1361 = vmatpush3.bf16.msra.mxu1 %v957_v22 }
 0x224   :  { %1377 = vmatpush3.bf16.msra.mxu0 %v1455_v28 }
 0x225   :  { %1378 = vmatprep.subr.bf16.mxu0 %v1538_v36 }
 0x226   :  { %1363 = vmatmul.mubr.msk.bf16.vlgmr.msra.gmra.mrb[36].mxu1 %vm573_vm6, %v536_v18 }
 0x228   :  { %1379 = vmatpush3.bf16.msra.mxu0 %v1079_v30 }
 0x2c9   :  { %v615_v31 = vpop.f32.mrb[24].mxu1 }
 0x2ca   :  { %v1304_v32 = vpop.f32.mrb[25].mxu1 }
 0x2cb   :  { %v618_v33 = vpop.f32.mrb[26].mxu1 }
 0x2cc   :  { %v1305_v34 = vpop.f32.mrb[27].mxu1 }
 0x2d1   :  { %v759_v35 = vpop.f32.mrb[24].mxu0 }
 0x2d2   :  { %v1328_v37 = vpop.f32.mrb[25].mxu0 }
 0x2d3   :  { %v762_v38 = vpop.f32.mrb[26].mxu0 }
 0x2d4   :  { %v1329_v39 = vpop.f32.mrb[27].mxu0 }
 0x2d9   :  { %v683_v40 = vpop.f32.mrb[28].mxu1 }
 0x2da   :  { %v684_v41 = vadd.f32 %v683_v40, %v615_v31  ;;  %v1316_v44 = vpop.f32.mrb[29].mxu1 }
 0x2db   :  { %v686_v45 = vpop.f32.mrb[30].mxu1 }
 0x2dc   :  { %v687_v46 = vadd.f32 %v686_v45, %v618_v33  ;;  %v1317_v47 = vpop.f32.mrb[31].mxu1  ;;  %v766_v48 = vadd.f32 %v759_v35, %v684_v41 }
 0x2de   :  { %v767_v49 = vadd.f32 %v762_v38, %v687_v46 }
 0x2e1   :  { %v915_v50 = vpop.f32.mrb[28].mxu0 }
 0x2e2   :  { %v1352_v36 = vpop.f32.mrb[29].mxu0 }
 0x2e3   :  { %v918_v51 = vpop.f32.mrb[30].mxu0 }
 0x2e4   :  { %v1353_v52 = vpop.f32.mrb[31].mxu0 }
 0x2e9   :  { %v837_v53 = vpop.f32.mrb[32].mxu1 }
 0x2ea   :  { %v844_v54 = vadd.f32 %v837_v53, %v766_v48  ;;  %v1340_v55 = vpop.f32.mrb[33].mxu1 }
 0x2eb   :  { %v840_v56 = vpop.f32.mrb[34].mxu1 }
 0x2ec   :  { %v845_v57 = vadd.f32 %v840_v56, %v767_v49  ;;  %v1341_v58 = vpop.f32.mrb[35].mxu1  ;;  %v922_v59 = vadd.f32 %v915_v50, %v844_v54 }
 0x2ee   :  { %v923_v60 = vadd.f32 %v918_v51, %v845_v57 }
 0x2f9   :  { %v993_v61 = vpop.f32.mrb[36].mxu1 }
 0x2fa   :  { %v1000_v63 = vadd.f32 %v993_v61, %v922_v59  ;;  %v1364_v0 = vpop.f32.mrb[37].mxu1 }
 0x2fb   :  { %v996_v1 = vpop.f32.mrb[38].mxu1 }
 0x2fc   :  { %v1009_v42 = vadd.f32 %v1246_v62, %v1000_v63  ;;  %v1001_v2 = vadd.f32 %v996_v1, %v923_v60  ;;  %v1365_v3 = vpop.f32.mrb[39].mxu1 }
 0x2fe   :  { %v1010_v43 = vadd.f32 %v1246_v62, %v1001_v2  ;;  %1529 = vtanh.f32 %v1009_v42 }
 0x300   :  { %1531 = vtanh.f32 %v1010_v43 }
 0x308   :  { %v1530_v4 = vpop.eup %1529 }
 0x30a   :  { %v1532_v5 = vpop.eup %1531 }
 0x30b   :  { %v1013_v6 = vpack.c.bf16 %v1532_v5, %v1530_v4 }
 0x30d   :  { %1381 = vmatmul.mubr.msk.bf16.vlgmr.msra.gmra.mrb[32].mxu0 %vm1073_vm8, %v1013_v6 }
 0x3e0   :  { %v1115_v8 = vpop.f32.mrb[32].mxu0 }
 0x3e1   :  { %v1116_v9 = vadd.f32 %v1247_v7, %v1115_v8  ;;  %v1382_v10 = vpop.f32.mrb[33].mxu0 }
 0x3e2   :  { %v1118_v12 = vpop.f32.mrb[34].mxu0 }
 0x3e3   :  { %1533 = vtanh.f32 %v1116_v9  ;;  %v1119_v11 = vadd.f32 %v1247_v7, %v1118_v12  ;;  %v1383_v13 = vpop.f32.mrb[35].mxu0 }
 0x3e5   :  { %1535 = vtanh.f32 %v1119_v11 }
 0x3ed   :  { %v1534_v14 = vpop.eup %1533 }
 0x3ee   :  { %v1124_v15 = vmul.f32 0.5, %v1534_v14 }
 0x3ef   :  { %v1536_v16 = vpop.eup %1535 }
 0x3f0   :  { %v1126_v17 = vadd.f32 0.5, %v1124_v15  ;;  %v1125_v18 = vmul.f32 0.5, %v1536_v16 }
 0x3f2   :  { %1129 = vst.msk [vmem:[%s1939_s9] sm:$0xff] %vm1128_vm9, %v1126_v17  ;;  %v1127_v19 = vadd.f32 0.5, %v1125_v18 }
 0x3f4   :  { %1130 = vst.msk [vmem:[%s1939_s9 + $0x8] sm:$0xff] %vm1128_vm9, %v1127_v19 }

</bundles_post_ra>
